<compile_context>
chip_gen: v5e
topology: v5e:2x2
jax: 0.10.0
libtpu: 0.0.40
codegen_flags: <defaults>
</compile_context>

<pallas_src>
import jax
import jax.numpy as jnp
from jax.experimental import pallas as pl
from jax.experimental.pallas import tpu as pltpu

K_IN, HIDDEN, OUT = 4, 10, 3        # logical dims of the module
H_PAD, OUT_PAD = 16, 4              # sublane-padded hidden / output rows


def mlp_kernel(x_ref, w1_ref, b1_ref, w2_ref, b2_ref, o_ref):
    # x_ref:  (K_IN, TB)        batch tile, batch on lanes
    # w1_ref: (H_PAD, K_IN)     b1_ref: (H_PAD, 1)
    # w2_ref: (OUT_PAD, H_PAD)  b2_ref: (OUT_PAD, 1)
    # o_ref:  (OUT_PAD, TB)
    x = x_ref[...]
    # Layer 1 on the MXU; bias add + ReLU on the VPU.
    h = jnp.dot(w1_ref[...], x, preferred_element_type=jnp.float32) + b1_ref[...]
    h = jnp.maximum(h, 0.0)
    # Layer 2 on the MXU.
    y = jnp.dot(w2_ref[...], h, preferred_element_type=jnp.float32) + b2_ref[...]
    o_ref[...] = y.astype(o_ref.dtype)


def pack_params(w1, b1, w2, b2):
    """One-time host-side zero-padding of the PyTorch-layout params
    (w1: (10,4), b1: (10,), w2: (3,10), b2: (3,)) to sublane-aligned shapes."""
    w1p = jnp.zeros((H_PAD, K_IN), jnp.float32).at[:HIDDEN, :].set(w1)
    b1p = jnp.zeros((H_PAD, 1), jnp.float32).at[:HIDDEN, 0].set(b1)
    w2p = jnp.zeros((OUT_PAD, H_PAD), jnp.float32).at[:OUT, :HIDDEN].set(w2)
    b2p = jnp.zeros((OUT_PAD, 1), jnp.float32).at[:OUT, 0].set(b2)
    return w1p, b1p, w2p, b2p


def _choose_tb(batch, max_tb):
    """Lane tile: a multiple of 128, <= max_tb, and aimed at >= 2 grid tiles
    so v7x's two TensorCores both get work (no effect on single-TC v5e/v6e)."""
    max_tb = max(128, (int(max_tb) // 128) * 128)     # lane-dense guard
    half = 128 * pl.cdiv(pl.cdiv(batch, 2), 128)      # ~half batch, 128-aligned
    return min(max_tb, half)


def net_forward(x, packed, *, max_tb=65536):
    """x: (B, 4) float32 -> (B, 3) float32, same math as Net.forward()."""
    w1p, b1p, w2p, b2p = packed
    B = x.shape[0]
    tb = _choose_tb(B, max_tb)
    n_tiles = pl.cdiv(B, tb)
    b_pad = n_tiles * tb

    # Layout plumbing for the standalone API only: batch onto the lane axis.
    xT = jnp.pad(x.astype(jnp.float32).T, ((0, 0), (0, b_pad - B)))

    yT = pl.pallas_call(
        mlp_kernel,
        out_shape=jax.ShapeDtypeStruct((OUT_PAD, b_pad), jnp.float32),
        grid=(n_tiles,),
        in_specs=[
            # x: one lane-dense batch tile per grid step.
            # (v5e: add pipeline_mode=pl.Buffered(3) here if profiling shows
            #  exposed input DMA.)
            pl.BlockSpec((K_IN, tb), lambda i: (0, i)),
            # weights/biases: constant index maps -> VMEM-resident for the grid.
            pl.BlockSpec((H_PAD, K_IN), lambda i: (0, 0)),
            pl.BlockSpec((H_PAD, 1), lambda i: (0, 0)),
            pl.BlockSpec((OUT_PAD, H_PAD), lambda i: (0, 0)),
            pl.BlockSpec((OUT_PAD, 1), lambda i: (0, 0)),
        ],
        out_specs=pl.BlockSpec((OUT_PAD, tb), lambda i: (0, i)),
        compiler_params=pltpu.CompilerParams(
            dimension_semantics=("parallel",),     # v7x: split tiles across TCs
            vmem_limit_bytes=32 * 1024 * 1024,     # v5e scoped default (16 MiB) is too small for huge tiles
        ),
    )(xT, w1p, b1p, w2p, b2p)

    return yT[:OUT, :B].T


def init_params(key):
    # PyTorch nn.Linear default init: U(-1/sqrt(fan_in), 1/sqrt(fan_in)),
    # weights in PyTorch (out_features, in_features) layout.
    k1, k2, k3, k4 = jax.random.split(key, 4)
    bound1 = 1.0 / jnp.sqrt(float(K_IN))
    bound2 = 1.0 / jnp.sqrt(float(HIDDEN))
    w1 = jax.random.uniform(k1, (HIDDEN, K_IN), jnp.float32, -bound1, bound1)
    b1 = jax.random.uniform(k2, (HIDDEN,), jnp.float32, -bound1, bound1)
    w2 = jax.random.uniform(k3, (OUT, HIDDEN), jnp.float32, -bound2, bound2)
    b2 = jax.random.uniform(k4, (OUT,), jnp.float32, -bound2, bound2)
    return w1, b1, w2, b2


if __name__ == "__main__":
    key = jax.random.PRNGKey(0)
    pkey, xkey = jax.random.split(key)
    w1, b1, w2, b2 = init_params(pkey)
    packed = pack_params(w1, b1, w2, b2)        # one-time aligned packing

    batch = 200                                  # small demo shape; exercises
    x = jax.random.normal(xkey, (batch, K_IN), jnp.float32)  # 2 tiles + padding

    forward = jax.jit(net_forward, static_argnames=("max_tb",))
    out = jax.block_until_ready(forward(x, packed))

    # Plain-JAX reference (same math as the PyTorch module).
    ref = jnp.maximum(x @ w1.T + b1, 0.0) @ w2.T + b2
    assert out.shape == (batch, OUT)
    err = float(jnp.max(jnp.abs(out - ref)))
    # Generous bound: MXU f32 matmuls (in the kernel and/or the XLA reference)
    # may use bf16 multi-pass decomposition; structural bugs would be O(1).
    assert err < 5e-2, f"max abs error {err}"

    print("KERNEL_OK")
</pallas_src>

<mosaic_0001>
module attributes {stable_mosaic.version = 11 : i64} {
  func.func @mlp_kernel(%arg0: i32, %arg1: memref<4x128xf32, #tpu.memory_space<vmem>>, %arg2: memref<16x4xf32, #tpu.memory_space<vmem>>, %arg3: memref<16x1xf32, #tpu.memory_space<vmem>>, %arg4: memref<4x16xf32, #tpu.memory_space<vmem>>, %arg5: memref<4x1xf32, #tpu.memory_space<vmem>>, %arg6: memref<4x128xf32, #tpu.memory_space<vmem>>) attributes {dimension_semantics = [#tpu.dimension_semantics<parallel>], iteration_bounds = array<i64: 2>, scalar_prefetch = 0 : i64, scratch_operands = 0 : i64, tpu.core_type = #tpu.core_type<tc>, window_params = [{transform_indices = @transform_0, window_bounds = array<i64: 4, 128>}, {pipeline_mode = #tpu.pipeline_mode<synchronous>, transform_indices = @transform_1, window_bounds = array<i64: 16, 4>}, {pipeline_mode = #tpu.pipeline_mode<synchronous>, transform_indices = @transform_2, window_bounds = array<i64: 16, 1>}, {pipeline_mode = #tpu.pipeline_mode<synchronous>, transform_indices = @transform_3, window_bounds = array<i64: 4, 16>}, {pipeline_mode = #tpu.pipeline_mode<synchronous>, transform_indices = @transform_4, window_bounds = array<i64: 4, 1>}, {transform_indices = @transform_5, window_bounds = array<i64: 4, 128>}]} {
    %c0 = arith.constant 0 : index
    %c0_0 = arith.constant 0 : index
    %0 = vector.load %arg1[%c0, %c0_0] : memref<4x128xf32, #tpu.memory_space<vmem>>, vector<4x128xf32>
    %c0_1 = arith.constant 0 : index
    %c0_2 = arith.constant 0 : index
    %1 = vector.load %arg2[%c0_1, %c0_2] : memref<16x4xf32, #tpu.memory_space<vmem>>, vector<16x4xf32>
    %cst = arith.constant dense<0.000000e+00> : vector<16x128xf32>
    %2 = tpu.matmul %1, %0, %cst {dimension_numbers = #tpu.dot_dimension_numbers<[1], [0], [0], [1], [0, 0, 1, 1], [], []>} : vector<16x4xf32>, vector<4x128xf32>, vector<16x128xf32> -> vector<16x128xf32>
    %c0_3 = arith.constant 0 : index
    %c0_4 = arith.constant 0 : index
    %3 = vector.load %arg3[%c0_3, %c0_4] : memref<16x1xf32, #tpu.memory_space<vmem>>, vector<16x1xf32>
    %4 = vector.broadcast %3 : vector<16x1xf32> to vector<16x128xf32>
    %5 = arith.addf %2, %4 : vector<16x128xf32>
    %cst_5 = arith.constant 0.000000e+00 : f32
    %6 = vector.broadcast %cst_5 : f32 to vector<16x128xf32>
    %7 = arith.maximumf %5, %6 : vector<16x128xf32>
    %c0_6 = arith.constant 0 : index
    %c0_7 = arith.constant 0 : index
    %8 = vector.load %arg4[%c0_6, %c0_7] : memref<4x16xf32, #tpu.memory_space<vmem>>, vector<4x16xf32>
    %cst_8 = arith.constant dense<0.000000e+00> : vector<4x128xf32>
    %9 = tpu.matmul %8, %7, %cst_8 {dimension_numbers = #tpu.dot_dimension_numbers<[1], [0], [0], [1], [0, 0, 1, 1], [], []>} : vector<4x16xf32>, vector<16x128xf32>, vector<4x128xf32> -> vector<4x128xf32>
    %c0_9 = arith.constant 0 : index
    %c0_10 = arith.constant 0 : index
    %10 = vector.load %arg5[%c0_9, %c0_10] : memref<4x1xf32, #tpu.memory_space<vmem>>, vector<4x1xf32>
    %11 = vector.broadcast %10 : vector<4x1xf32> to vector<4x128xf32>
    %12 = arith.addf %9, %11 : vector<4x128xf32>
    %c0_11 = arith.constant 0 : index
    %c0_12 = arith.constant 0 : index
    %13 = vector.load %arg6[%c0_11, %c0_12] : memref<4x128xf32, #tpu.memory_space<vmem>>, vector<4x128xf32>
    tpu.vector_store %arg6[%c0_11, %c0_12], %12 {strides = array<i32>} : memref<4x128xf32, #tpu.memory_space<vmem>>, vector<4x128xf32>,
    return
  }
  func.func @transform_0(%arg0: i32) -> (i32, i32) {
    %c0_i32 = arith.constant 0 : i32
    %c0_i32_0 = arith.constant 0 : i32
    return %c0_i32, %arg0 : i32, i32
  }
  func.func @transform_1(%arg0: i32) -> (i32, i32) {
    %c0_i32 = arith.constant 0 : i32
    %c0_i32_0 = arith.constant 0 : i32
    %c0_i32_1 = arith.constant 0 : i32
    return %c0_i32, %c0_i32_0 : i32, i32
  }
  func.func @transform_2(%arg0: i32) -> (i32, i32) {
    %c0_i32 = arith.constant 0 : i32
    %c0_i32_0 = arith.constant 0 : i32
    %c0_i32_1 = arith.constant 0 : i32
    return %c0_i32, %c0_i32_0 : i32, i32
  }
  func.func @transform_3(%arg0: i32) -> (i32, i32) {
    %c0_i32 = arith.constant 0 : i32
    %c0_i32_0 = arith.constant 0 : i32
    %c0_i32_1 = arith.constant 0 : i32
    return %c0_i32, %c0_i32_0 : i32, i32
  }
  func.func @transform_4(%arg0: i32) -> (i32, i32) {
    %c0_i32 = arith.constant 0 : i32
    %c0_i32_0 = arith.constant 0 : i32
    %c0_i32_1 = arith.constant 0 : i32
    return %c0_i32, %c0_i32_0 : i32, i32
  }
  func.func @transform_5(%arg0: i32) -> (i32, i32) {
    %c0_i32 = arith.constant 0 : i32
    %c0_i32_0 = arith.constant 0 : i32
    return %c0_i32, %arg0 : i32, i32
  }
}

</mosaic_0001>

<bundles_post_ra>
// kernel: net_forward.1
= control target key start
LH: loop header
LB: loop body
LE: loop exit
PB: predicated region body
PF: predicated region fallthrough
CT: control target
= control target key end

     0   :  { %s420_s18 = smov 0   ;;  %s462_s0 = inlined_call_operand.vmem [shape: f32[4,256], index: 0, kind: input, shape index: {}]   ;;  %s463_s1 = inlined_call_operand.vmem [shape: f32[16,4], index: 1, kind: input, shape index: {}]   ;;  %s464_s2 = inlined_call_operand.vmem [shape: f32[16,1], index: 2, kind: input, shape index: {}]   ;;  %s465_s3 = inlined_call_operand.vmem [shape: f32[4,16], index: 3, kind: input, shape index: {}]   ;;  %s466_s4 = inlined_call_operand.vmem [shape: f32[4,1], index: 4, kind: input, shape index: {}]   ;;  %s467_s5 = inlined_call_operand.vmem [shape: f32[4,256], index: 5, kind: output, shape index: {}]  }
   0x1 LB: > { %s356_s19 = sadd.s32 4294967295, %s387_s18   ;;  %p360_p0 = scmp.ge.s32.totalorder %s387_s18, 1  ;;  %s387_s18 = sphi %s420_s18, %s15_s18  }
   0x2   : > { %p186_p1 = scmp.lt.s32.totalorder %s387_s18, 3 }
   0x4   : > { %p187_p2 = pnand %p360_p0, %p186_p1 }
   0x5   : > { %p212_p3 = scmp.lt.s32.totalorder (!%p187_p2), %s356_s19, 1 }
   0x6   : > { %190 = sbr.rel (%p187_p2) target bundleno = 284 (0x11c), region = 40 }
   0xb   : > { %v389_v0 = vmov 0   ;;  %v224_v1 = vld [vmem:[%s464_s2 + $0x8] sm:$0xff]  ;;  %s469_s19 = smov (!%p212_p3, %s356_s19), 1  ;;  %vm242_vm0 = vcmask 1043456   ;;  %v221_v2 = vld [vmem:[%s463_s1] sm:$0xff]  ;;  %vm235_vm1 = vcmask 31744  }
   0xc   : > { %379 = vset.pattern.permute.xlu0 %v389_v0  ;;  %380 = vset.pattern.permute.xlu1 %v389_v0  ;;  %s361_s22 = sshll.u32 %s469_s19, 2  ;;  %v222_v3 = vld [vmem:[%s463_s1 + $0x8] sm:$0xff]  ;;  %v223_v5 = vld [vmem:[%s464_s2] sm:$0xff]  ;;  %vm278_vm2 = vcmask 130048  }
   0xd   : > { %232 = vperm.xlu0 %379, %v224_v1   ;;  %s215_s25 = scalar_lea.vmem %s462_s0, %s361_s22  ;;  %v272_v6 = vld [vmem:[%s466_s4] sm:$0xf]  ;;  %s219_s13 = scalar_lea.vmem %s467_s5, %s361_s22 }
   0xe   : > { %v220_v4 = vld [vmem:[%s215_s25] sm:$0xf]  ;;  %275 = vperm.xlu1 %380, %v272_v6  }
   0xf   : > { %363 = vmatpush.msk.msra.mxu0 %vm242_vm0, %v220_v4  ;;  %369 = vmatpush.msk.msra.mxu2 %vm242_vm0, %v220_v4  ;;  %v271_v15 = vld [vmem:[%s465_s3] sm:$0xf] }
  0x10   : > { %364 = vmatmul.msk.f32.vlgmr.msra.gmra.mxu0 %vm235_vm1, %v221_v2  ;;  %365 = vmatmul.msk.f32.vlgmr.msra.gmra.mxu2 %vm235_vm1, %v222_v3 }
  0x15   : > { %227 = vperm.xlu0 %379, %v223_v5  }
  0x7f   : > { %v233_v7 = vpop.permute.xlu0 %232 }
  0x80   : > { %v276_v16 = vpop.permute.xlu1 %275 }
  0x87   : > { %v228_v8 = vpop.permute.xlu0 %227 }
  0x8d   : > { %v263_v9 = vpop.f32.mrf.mxu0 }
  0x8e   : > { %v264_v11 = vadd.f32 %v263_v9, %v228_v8 }
  0x90   : > { %v269_v14 = vmax.f32 %v264_v11, 0.0 }
  0x93   : > { %v266_v10 = vpop.f32.mrf.mxu2 }
  0x94   : > { %v267_v12 = vadd.f32 %v266_v10, %v233_v7 }
  0x96   : > { %v270_v13 = vmax.f32 %v267_v12, 0.0 }
  0x98   : > { %296 = vmatpush.msra.mxu1 %v270_v13 }
  0x9a   : > { %297 = vmatpush.msra.mxu1 %v269_v14 }
  0x9b   : > { %366 = vmatmul.msk.f32.vlgmr.msra.gmra.mxu1 %vm278_vm2, %v271_v15 }
 0x118   : > { %v299_v17 = vpop.f32.mrf.mxu1 }
 0x119   : > { %v300_v18 = vadd.f32 %v299_v17, %v276_v16 }
 0x11b   : > { %302 = vst [vmem:[%s219_s13] sm:$0xf] %v300_v18 }
 0x11c PF: > { %s15_s18 = sadd.s32 1, %s387_s18  }
 0x11d   : > { %p12_p4 = scmp.ge.s32.totalorder %s15_s18, 4  }
 0x11f   :  { %14 = sbr.rel (!%p12_p4) target bundleno = 1 (0x1), region = 70 }

</bundles_post_ra>
